<compile_context>
chip_gen: v7x
topology: tpu7x:2x2x1
jax: 0.10.0
libtpu: 0.0.40
codegen_flags: <defaults>
</compile_context>

<pallas_src>
import functools

import jax
import jax.numpy as jnp
from jax import lax
from jax.experimental import pallas as pl
from jax.experimental.pallas import tpu as pltpu

# Module __init__ defaults: weights=[1, 1], reduction='mean'.
W0 = 1.0
W1 = 1.0
IGNORE_INDEX = -100  # nn.CrossEntropyLoss default

_SUBLANE = 8
_LANE = 128
_MIN_LANE_DENSE_C = 128   # below this the Pallas path is lane-sparse -> XLA


def _round_up(x, m):
    return (x + m - 1) // m * m


def _vmem_limit_bytes():
    """0.75x the physical per-core VMEM (v5e/v6e: 128 MiB, v7x: 64 MiB)."""
    try:
        cap = pltpu.get_tpu_info().vmem_capacity_bytes
    except Exception:
        cap = 64 * 1024 * 1024          # conservative (v7x-sized) fallback
    return int(0.75 * cap)


def _pick_batch_tile(b, c, itemsize, vmem_limit, max_batch_tile=None):
    """Byte-based batch-tile choice.

    Working set per batch row: 2 double-buffered input-dtype DMA tiles plus
    ~5 full-tile temporaries in the body (f32 upcast, x-m/exp result, i32 iota,
    compare mask, raw-dtype select) -> ~ c*(3*itemsize + 5*4) bytes.  Half the
    VMEM limit is handed to the tile so the output block and compiler scratch
    keep headroom on every generation.
    """
    align = max(_SUBLANE, 32 // itemsize)        # 8 f32 / 16 bf16 / 32 int8
    per_row = c * (3 * itemsize + 5 * 4) + 64
    tb = (vmem_limit // 2) // max(per_row, 1)
    if max_batch_tile is not None:               # safety bound only
        tb = min(tb, max_batch_tile)
    tb = min(tb, _round_up(b, align))            # never bigger than the batch
    tb = max(align, (tb // align) * align)
    return tb


def _ce_tile_kernel(logits_ref, tgt_ref, out_ref, *, tb, b_total):
    """Masked NLL sum + valid-target count for one (TB, C) batch tile."""
    x_raw = logits_ref[...]                                    # (TB, C) in-dtype
    t = tgt_ref[...]                                           # (TB, 1) i32

    # logsumexp path in f32 (exp/log on the EUP; row max m kept explicit).
    x = x_raw.astype(jnp.float32)
    m = jnp.max(x, axis=-1, keepdims=True)                     # (TB, 1)
    sumexp = jnp.sum(jnp.exp(x - m), axis=-1, keepdims=True)   # (TB, 1)

    # One-hot pick of the target logit on the RAW tile (exact: it selects one
    # original element), cast afterwards -> one fewer f32 full-tile temporary.
    col = lax.broadcasted_iota(jnp.int32, x_raw.shape, 1)      # (TB, C)
    x_t = jnp.sum(jnp.where(col == t, x_raw, 0),
                  axis=-1, keepdims=True).astype(jnp.float32)  # (TB, 1)

    nll = (m + jnp.log(sumexp)) - x_t                          # (TB, 1)

    # Validity: in-bounds row of the (possibly ragged) last tile AND not
    # ignore_index.  Use jnp.where (not multiply) so garbage rows of the
    # ragged tile cannot leak NaN/Inf into the sum.
    row = lax.broadcasted_iota(jnp.int32, (tb, 1), 0)
    row_valid = (pl.program_id(0) * tb + row) < b_total
    valid = jnp.logical_and(row_valid, t != IGNORE_INDEX)      # (TB, 1) bool

    tile_sum = jnp.sum(jnp.where(valid, nll, 0.0))             # scalar
    tile_cnt = jnp.sum(valid.astype(jnp.float32))              # scalar

    # One aligned (8, 128) block per grid step: lane 0 = NLL sum, lane 1 =
    # valid count, rest 0.  Full unmasked store; distinct block per step, so
    # the batch axis stays megacore-"parallel" safe.
    lane = lax.broadcasted_iota(jnp.int32, (_SUBLANE, _LANE), 1)
    out_ref[...] = jnp.where(lane == 0, tile_sum,
                             jnp.where(lane == 1, tile_cnt, 0.0))


def _ce_nll_sum_count(logits, targets, *, max_batch_tile=None):
    """Pallas path: (sum of NLL over valid targets, number of valid targets)."""
    b, c = logits.shape
    itemsize = jnp.dtype(logits.dtype).itemsize
    vmem_limit = _vmem_limit_bytes()
    tb = _pick_batch_tile(b, c, itemsize, vmem_limit, max_batch_tile)
    nt = pl.cdiv(b, tb)

    t = targets.reshape(b, 1).astype(jnp.int32)

    kernel = functools.partial(_ce_tile_kernel, tb=tb, b_total=b)
    partials = pl.pallas_call(
        kernel,
        out_shape=jax.ShapeDtypeStruct((_SUBLANE, nt * _LANE), jnp.float32),
        grid=(nt,),
        in_specs=[
            # Logits DMA stays in the input dtype (bf16 stays bf16); the f32
            # upcast happens on the VMEM tile inside the kernel.
            pl.BlockSpec((tb, c), lambda i: (i, 0)),
            pl.BlockSpec((tb, 1), lambda i: (i, 0)),
        ],
        out_specs=pl.BlockSpec((_SUBLANE, _LANE), lambda i: (0, i)),
        compiler_params=pltpu.CompilerParams(
            dimension_semantics=("parallel",),
            vmem_limit_bytes=vmem_limit,
        ),
    )(logits, t)

    row0 = partials[0].reshape(nt, _LANE)
    return jnp.sum(row0[:, 0]), jnp.sum(row0[:, 1])


def _ce_mean_xla(logits, targets):
    """Plain-XLA masked-mean cross entropy (used for lane-sparse C < 128)."""
    logp = jax.nn.log_softmax(logits.astype(jnp.float32), axis=-1)
    t = targets.astype(jnp.int32)
    valid = t != IGNORE_INDEX
    safe_t = jnp.where(valid, t, 0)
    nll = -jnp.take_along_axis(logp, safe_t.reshape(-1, 1), axis=-1)[:, 0]
    return jnp.sum(jnp.where(valid, nll, 0.0)) / jnp.sum(valid.astype(jnp.float32))


def multi_target_loss(logits0, targets0, logits1, targets1,
                      weights=(W0, W1), max_batch_tile=None):
    """JAX equivalent of MultiTargetLoss.forward((out0, out1), t0, t1)."""
    loss = 0.0
    for w, logits, tgt in ((weights[0], logits0, targets0),
                           (weights[1], logits1, targets1)):
        if logits.shape[-1] < _MIN_LANE_DENSE_C:
            # TODO(synk): lane-dense repack (fold rows into lanes) for tiny C
            # instead of the XLA fallback.
            head = _ce_mean_xla(logits, tgt)
        else:
            nll_sum, n_valid = _ce_nll_sum_count(
                logits, tgt, max_batch_tile=max_batch_tile)
            head = nll_sum / n_valid          # reduction='mean'
        loss = loss + w * head
    return loss
    # TODO(synk): activation()/decodes() and the mutable `reduction` setter are
    # framework plumbing, not part of forward.


def _reference_loss(logits0, targets0, logits1, targets1, weights=(W0, W1)):
    """Pure-JAX reference: weighted mean cross-entropies with ignore_index."""
    return weights[0] * _ce_mean_xla(logits0, targets0) + \
           weights[1] * _ce_mean_xla(logits1, targets1)


if __name__ == "__main__":
    # QA-style shapes: batch=18, seq_len (classes per head) = 128 (lane-dense).
    # max_batch_tile=8 forces multiple batch tiles AND a ragged last tile
    # (18 = 8 + 8 + 2), exercising the in-kernel row mask + parallel partials.
    B, C = 18, 128
    key = jax.random.PRNGKey(0)
    k0, k1, k2, k3 = jax.random.split(key, 4)

    start_logits = jax.random.normal(k0, (B, C), dtype=jnp.float32)
    end_logits = jax.random.normal(k1, (B, C), dtype=jnp.float32)
    start_tgt = jax.random.randint(k2, (B,), 0, C, dtype=jnp.int32)
    end_tgt = jax.random.randint(k3, (B,), 0, C, dtype=jnp.int32)
    # Exercise the ignore_index=-100 path on one example of the second head.
    end_tgt = end_tgt.at[3].set(IGNORE_INDEX)

    loss = multi_target_loss(start_logits, start_tgt, end_logits, end_tgt,
                             max_batch_tile=8)
    loss = jax.block_until_ready(loss)

    ref = _reference_loss(start_logits, start_tgt, end_logits, end_tgt)
    assert jnp.allclose(loss, ref, rtol=1e-5, atol=1e-5), (loss, ref)

    print("KERNEL_OK")
</pallas_src>

<mosaic_0001>
module attributes {stable_mosaic.version = 11 : i64} {
  func.func @_ce_tile_kernel(%arg0: i32, %arg1: memref<8x128xf32, #tpu.memory_space<vmem>>, %arg2: memref<8x1xi32, #tpu.memory_space<vmem>>, %arg3: memref<8x128xf32, #tpu.memory_space<vmem>>) attributes {dimension_semantics = [#tpu.dimension_semantics<parallel>], iteration_bounds = array<i64: 3>, scalar_prefetch = 0 : i64, scratch_operands = 0 : i64, tpu.core_type = #tpu.core_type<tc>, window_params = [{transform_indices = @transform_0, window_bounds = array<i64: 8, 128>}, {transform_indices = @transform_1, window_bounds = array<i64: 8, 1>}, {transform_indices = @transform_2, window_bounds = array<i64: 8, 128>}]} {
    %c0 = arith.constant 0 : index
    %c0_0 = arith.constant 0 : index
    %0 = vector.load %arg1[%c0, %c0_0] : memref<8x128xf32, #tpu.memory_space<vmem>>, vector<8x128xf32>
    %c0_1 = arith.constant 0 : index
    %c0_2 = arith.constant 0 : index
    %1 = vector.load %arg2[%c0_1, %c0_2] : memref<8x1xi32, #tpu.memory_space<vmem>>, vector<8x1xi32>
    %cst = arith.constant dense<0xFF800000> : vector<8xf32>
    %2 = vector.multi_reduction <maximumf>, %0, %cst [1] : vector<8x128xf32> to vector<8xf32>
    %3 = vector.shape_cast %2 : vector<8xf32> to vector<8x1xf32>
    %4 = vector.broadcast %3 : vector<8x1xf32> to vector<8x128xf32>
    %5 = arith.subf %0, %4 : vector<8x128xf32>
    %6 = math.exp %5 : vector<8x128xf32>
    %cst_3 = arith.constant dense<0.000000e+00> : vector<8xf32>
    %7 = vector.multi_reduction <add>, %6, %cst_3 [1] : vector<8x128xf32> to vector<8xf32>
    %8 = vector.shape_cast %7 : vector<8xf32> to vector<8x1xf32>
    %9 = tpu.iota {dimensions = array<i32: 1>} : vector<8x128xi32>
    %10 = vector.broadcast %1 : vector<8x1xi32> to vector<8x128xi32>
    %11 = arith.cmpi eq, %9, %10 : vector<8x128xi32>
    %c0_i32 = arith.constant 0 : i32
    %12 = arith.sitofp %c0_i32 : i32 to f32
    %13 = vector.broadcast %12 : f32 to vector<8x128xf32>
    %14 = arith.select %11, %0, %13 : vector<8x128xi1>, vector<8x128xf32>
    %cst_4 = arith.constant dense<0.000000e+00> : vector<8xf32>
    %15 = vector.multi_reduction <add>, %14, %cst_4 [1] : vector<8x128xf32> to vector<8xf32>
    %16 = vector.shape_cast %15 : vector<8xf32> to vector<8x1xf32>
    %17 = math.log %8 : vector<8x1xf32>
    %18 = arith.addf %3, %17 : vector<8x1xf32>
    %19 = arith.subf %18, %16 : vector<8x1xf32>
    %20 = tpu.iota {dimensions = array<i32: 0>} : vector<8x1xi32>
    %c8_i32 = arith.constant 8 : i32
    %21 = arith.muli %arg0, %c8_i32 : i32
    %22 = vector.broadcast %21 : i32 to vector<8x1xi32>
    %23 = arith.addi %22, %20 : vector<8x1xi32>
    %c18_i32 = arith.constant 18 : i32
    %24 = vector.broadcast %c18_i32 : i32 to vector<8x1xi32>
    %25 = arith.cmpi slt, %23, %24 : vector<8x1xi32>
    %c-100_i32 = arith.constant -100 : i32
    %26 = vector.broadcast %c-100_i32 : i32 to vector<8x1xi32>
    %27 = arith.cmpi ne, %1, %26 : vector<8x1xi32>
    %28 = arith.andi %25, %27 : vector<8x1xi1>
    %cst_5 = arith.constant 0.000000e+00 : f32
    %29 = vector.broadcast %cst_5 : f32 to vector<8x1xf32>
    %30 = arith.select %28, %19, %29 : vector<8x1xi1>, vector<8x1xf32>
    %31 = vector.shape_cast %30 : vector<8x1xf32> to vector<1x8x1xf32>
    %cst_6 = arith.constant dense<0.000000e+00> : vector<1xf32>
    %32 = vector.multi_reduction <add>, %31, %cst_6 [1, 2] : vector<1x8x1xf32> to vector<1xf32>
    %33 = vector.shape_cast %32 : vector<1xf32> to vector<1x1x1xf32>
    %34 = vector.extract %33[0, 0, 0] : f32 from vector<1x1x1xf32>
    %35 = arith.extui %28 : vector<8x1xi1> to vector<8x1xi32>
    %36 = arith.sitofp %35 : vector<8x1xi32> to vector<8x1xf32>
    %37 = vector.shape_cast %36 : vector<8x1xf32> to vector<1x8x1xf32>
    %cst_7 = arith.constant dense<0.000000e+00> : vector<1xf32>
    %38 = vector.multi_reduction <add>, %37, %cst_7 [1, 2] : vector<1x8x1xf32> to vector<1xf32>
    %39 = vector.shape_cast %38 : vector<1xf32> to vector<1x1x1xf32>
    %40 = vector.extract %39[0, 0, 0] : f32 from vector<1x1x1xf32>
    %41 = tpu.iota {dimensions = array<i32: 1>} : vector<8x128xi32>
    %c0_i32_8 = arith.constant 0 : i32
    %42 = vector.broadcast %c0_i32_8 : i32 to vector<8x128xi32>
    %43 = arith.cmpi eq, %41, %42 : vector<8x128xi32>
    %c1_i32 = arith.constant 1 : i32
    %44 = vector.broadcast %c1_i32 : i32 to vector<8x128xi32>
    %45 = arith.cmpi eq, %41, %44 : vector<8x128xi32>
    %cst_9 = arith.constant 0.000000e+00 : f32
    %46 = vector.broadcast %40 : f32 to vector<8x128xf32>
    %47 = vector.broadcast %cst_9 : f32 to vector<8x128xf32>
    %48 = arith.select %45, %46, %47 : vector<8x128xi1>, vector<8x128xf32>
    %49 = vector.broadcast %34 : f32 to vector<8x128xf32>
    %50 = arith.select %43, %49, %48 : vector<8x128xi1>, vector<8x128xf32>
    %c0_10 = arith.constant 0 : index
    %c0_11 = arith.constant 0 : index
    %51 = vector.load %arg3[%c0_10, %c0_11] : memref<8x128xf32, #tpu.memory_space<vmem>>, vector<8x128xf32>
    tpu.vector_store %arg3[%c0_10, %c0_11], %50 {strides = array<i32>} : memref<8x128xf32, #tpu.memory_space<vmem>>, vector<8x128xf32>,
    return
  }
  func.func @transform_0(%arg0: i32) -> (i32, i32) {
    %c0_i32 = arith.constant 0 : i32
    %c0_i32_0 = arith.constant 0 : i32
    return %arg0, %c0_i32 : i32, i32
  }
  func.func @transform_1(%arg0: i32) -> (i32, i32) {
    %c0_i32 = arith.constant 0 : i32
    %c0_i32_0 = arith.constant 0 : i32
    return %arg0, %c0_i32 : i32, i32
  }
  func.func @transform_2(%arg0: i32) -> (i32, i32) {
    %c0_i32 = arith.constant 0 : i32
    %c0_i32_0 = arith.constant 0 : i32
    return %c0_i32, %arg0 : i32, i32
  }
}

</mosaic_0001>

<bundles_post_ra>
// kernel: tpu_custom_call.1
= control target key start
LH: loop header
LB: loop body
LE: loop exit
PB: predicated region body
PF: predicated region fallthrough
CT: control target
= control target key end

     0   :  { %7 = vsyncpa [#allocation3], 0  ;;  %s551_s0 = inlined_call_operand.vmem [shape: f32[18,128], index: 0, kind: input, shape index: {}]   ;;  %s552_s1 = inlined_call_operand.vmem [shape: s32[18,1], index: 1, kind: input, shape index: {}]   ;;  %s553_s2 = inlined_call_operand.hbm [shape: f32[8,384], index: 2, kind: output, shape index: {}]  }
   0x1   :  { %9 = vsyncpa [#allocation3 + $0x1], 0  ;;  %s447_s9 = smov 0   ;;  %s449_s10 = smov 0  }
   0x2   :  { %s451_s11 = smov 0   ;;  %s453_s12 = smov 0  }
   0x3 LB: > { %s468_s13 = sadd.s32 4294967295, %s427_s12   ;;  %s302_s14 = sadd.s32 4294967294, %s427_s12   ;;  %s427_s12 = sphi %s453_s12, %s559_s12   ;;  %s423_s11 = sphi %s451_s11, %s558_s11   ;;  %s419_s10 = sphi %s449_s10, %s557_s10   ;;  %s415_s9 = sphi %s447_s9, %s556_s9  }
   0x4   : > { %s472_s15 = sadd.s32 1, %s427_s12   ;;  %s74_s16 = sadd.s32 1, %s423_s11 }
   0x5   : > { %s71_s17 = ssub.s32 %s427_s12, %s472_s15  ;;  %p84_p0 = scmp.ne.s32.totalorder %s423_s11, %s419_s10 }
   0x6   : > { %p72_p1 = scmp.eq.s32.totalorder %s71_s17, 0  ;;  %p85_p2 = scmp.eq.s32.totalorder %s468_s13, 2 }
   0x7   : > { %p90_p3 = scmp.ne.s32.totalorder %s419_s10, %s415_s9  ;;  %p91_p4 = scmp.eq.s32.totalorder %s302_s14, 2 }
   0x8   : > { %s483_s18 = scalar_select %p72_p1, %s423_s11, %s74_s16  }
   0x9   : > { %p485_p5 = por %p85_p2, %p84_p0  ;;  %p489_p6 = por %p91_p4, %p90_p3 }
   0xa   : > { %p305_p7 = scmp.ge.s32.totalorder %s427_s12, 1  ;;  %p123_p8 = scmp.lt.s32.totalorder %s427_s12, 4 }
   0xc   : > { %p124_p9 = pnand %p305_p7, %p123_p8 }
   0xd   : > { %p148_p10 = scmp.lt.s32.totalorder (!%p124_p9), %s468_s13, 2  ;;  %v429_v0 = vmov (!%p124_p9), 0   ;;  %v165_v6 = vlaneseq (!%p124_p9)  ;;  %s309_s29 = sshll.u32 (!%p124_p9), %s468_s13, 3  ;;  %vm187_vm4 = vcmask (!%p124_p9), 7168   ;;  %v430_v21 = vmov (!%p124_p9), 0.0  }
   0xe   : > { %127 = sbr.rel (%p124_p9) target bundleno = 569 (0x239), region = 28  ;;  %360 = vset.pattern.permute.xlu0 (!%p124_p9), %v429_v0  ;;  %v181_v13 = vstv (!%p124_p9), %s309_s29  ;;  %s145_s30 = sand.u32 (!%p124_p9), 1, %s419_s10  }
   0xf   : > { %v166_v7 = vand.u32 (!%p124_p9), 127, %v165_v6  ;;  %v179_v12 = vshrl.u32 (!%p124_p9), %v165_v6, 7  ;;  %s306_s3 = sshll.u32 (!%p124_p9), %s145_s30, 3  ;;  %s312_s4 = sshll.u32 (!%p124_p9), %s468_s13, 7 }
  0x10   : > { %s147_s6 = scalar_lea.vmem (!%p124_p9), [#allocation2], %s306_s3  ;;  %s509_s17 = scalar_lea.hbm (!%p124_p9), %s553_s2, %s312_s4 }
  0x11   : > { %v182_v14 = vadd.s32 (!%p124_p9), %v181_v13, %v179_v12  ;;  %vm211_vm5 = vcmp.eq.s32.totalorder (!%p124_p9), %v166_v7, 1  ;;  %s231_s7 = sshll.u32 (!%p124_p9), %s147_s6, 4  ;;  %vm210_vm6 = vcmp.eq.s32.totalorder (!%p124_p9), %v166_v7, 0  ;;  %s511_s7 = int_to_ptr.vmem [resolvable:$true] %s231_s7 }
  0x13   : > { %vm183_vm2 = vcmp.lt.s32.totalorder (!%p124_p9), %v182_v14, 18 }
  0x15   : > { %s149_s21 = scalar_select %p148_p10, %s468_s13, 2 }
  0x16   : > { %s218_s13 = scalar_lea.sflag [#allocation3], %s145_s30 }
  0x17   : > { %s307_s22 = sshll.u32 %s149_s21, 3  ;;  %s365_s21 = scalar_lea.vmem %s511_s7, 128 }
  0x18   : > { %s151_s25 = scalar_lea.vmem %s551_s0, %s307_s22  ;;  %s155_s28 = scalar_lea.vmem %s552_s1, %s307_s22 }
  0x19   : > { %v156_v1 = vld [vmem:[%s151_s25] sm:$0xff]  ;;  %p366_p11 = scmp.ne.s32.totalorder %s511_s7, %s365_s21  ;;  %s431_s22 = smov [#allocation2]  }
  0x1a   : > { %158 = vmax.xlane.f32.xlu0 %v156_v1  ;;  %v157_v2 = vld [vmem:[%s155_s28] sm:$0xff]  ;;  %s369_s23 = sshll.u32 %s431_s22, 4  ;;  %s370_s23 = int_to_ptr.vmem [resolvable:$false] %s369_s23 }
  0x1b   : > { %vm184_vm1 = vcmp.ne.s32.totalorder %v157_v2, 4294967196  ;;  %p367_p12 = pnand %p366_p11, %p485_p5  ;;  %s371_s24 = scalar_lea.vmem %s370_s23, 256 }
  0x1c   : > { %vm185_vm3 = vmand %vm183_vm2, %vm184_vm1  ;;  %p372_p0 = scmp.lt.s32.totalorder %s511_s7, %s370_s23  ;;  %p373_p1 = scmp.lt.s32.totalorder %s371_s24, %s365_s21 }
  0x1d   : > { %v310_v22 = vsel %vm185_vm3, 1.0, %v430_v21  ;;  %p368_p13 = pneg %p367_p12 }
  0x1e   : > { %v200_v24 = vsel %vm187_vm4, %v310_v22, 0.0  ;;  %p374_p2 = por %p373_p1, %p372_p0 }
  0x20   : > { %p375_p3 = pnand %p374_p2, %p368_p13 }
  0x30   : > { %168 = vperm.xlu0 %360, %v157_v2  }
  0xa7   : > { %v159_v3 = vpop.xlane.xlu0 %158 }
  0xa8   : > { %v160_v4 = vsub.f32 %v156_v1, %v159_v3 }
  0xaa   : > { %v161_v5 = vmul.f32 1.442695, %v160_v4 }
  0xac   : > { %361 = vpow2.f32 %v161_v5 }
  0xaf   : > { %v169_v8 = vpop.permute.xlu0 %168 }
  0xb0   : > { %vm170_vm0 = vcmp.eq.s32.totalorder %v166_v7, %v169_v8 }
  0xb1   : > { %v171_v10 = vsel %vm170_vm0, %v156_v1, 0.0 }
  0xb6   : > { %v362_v9 = vpop.eup %361 }
  0xb7   : > { %163 = vadd.xlane.f32.xlu1 %v362_v9 }
  0xbb   : > { %172 = vadd.xlane.f32.xlu1 %v171_v10 }
 0x144   : > { %v164_v11 = vpop.xlane.xlu1 %163 }
 0x145   : > { %363 = vlog2.f32 %v164_v11 }
 0x148   : > { %v173_v17 = vpop.xlane.xlu1 %172 }
 0x14f   : > { %v364_v15 = vpop.eup %363 }
 0x150   : > { %v175_v16 = vmul.f32 0.6931472, %v364_v15 }
 0x152   : > { %v176_v18 = vadd.f32 %v175_v16, %v159_v3 }
 0x154   : > { %v177_v19 = vsub.f32 %v176_v18, %v173_v17 }
 0x156   : > { %v186_v20 = vsel %vm185_vm3, %v177_v19, 0.0 }
 0x157   : > { %v188_v23 = vsel %vm187_vm4, %v186_v20, 0.0 }
 0x158   : > { %189 = vadd.xlane.f32.xlu1 %v188_v23 }
 0x15c   : > { %201 = vadd.xlane.f32.xlu1 %v200_v24 }
 0x1e5   : > { %v190_v25 = vpop.xlane.xlu1 %189 }
 0x1e6   : > { %v191_v26 = vrot.slane %v190_v25, 4 }
 0x1e8   : > { %v192_v27 = vadd.f32 %v191_v26, %v190_v25 }
 0x1e9   : > { %v202_v28 = vpop.xlane.xlu1 %201 }
 0x1ea   : > { %v193_v29 = vrot.slane %v192_v27, 2  ;;  %v203_v30 = vrot.slane %v202_v28, 4 }
 0x1ec   : > { %v204_v31 = vadd.f32 %v203_v30, %v202_v28  ;;  %v194_v32 = vadd.f32 %v193_v29, %v192_v27 }
 0x1ee   : > { %v205_v33 = vrot.slane %v204_v31, 2  ;;  %v195_v34 = vrot.slane %v194_v32, 1 }
 0x1f0   : > { %v206_v35 = vadd.f32 %v205_v33, %v204_v31  ;;  %v196_v36 = vadd.f32 %v195_v34, %v194_v32 }
 0x1f2   : > { %315 = vpush %v196_v36  ;;  %v207_v37 = vrot.slane %v206_v35, 1 }
 0x1f4   : > { %v208_v38 = vadd.f32 %v207_v37, %v206_v35 }
 0x1f6   : > { %317 = vpush %v208_v38 }
 0x223   : > { %s316_s5 = spop %315 }
 0x224   : > { %v214_v40 = vstv %s316_s5 }
 0x227   : > { %s318_s8 = spop %317 }
 0x228   : > { %v212_v39 = vstv %s318_s8 }
 0x229   : > { %v213_v41 = vsel %vm211_vm5, %v212_v39, 0.0 }
 0x22a   : > { %v215_v42 = vsel %vm210_vm6, %v214_v40, %v213_v41 }
 0x22b   : > { %216 = vst [vmem:[%s147_s6] sm:$0xff] %v215_v42 }
 0x22c   : > { %378 = shalt.err (!%p375_p3)
}
 0x22d   : > { %s379_s25 = scalar_lea.hbm %s509_s17, 128  ;;  %s383_s28 = scalar_lea.hbm %s553_s2, 384 }
 0x22e   : > { %p380_p4 = scmp.ne.s32.totalorder %s509_s17, %s379_s25  ;;  %p384_p9 = scmp.lt.u32.totalorder %s509_s17, %s553_s2 }
 0x22f   : > { %p385_p10 = scmp.lt.u32.totalorder %s383_s28, %s379_s25  ;;  %p387_p12 = scmp.lt.u32.totalorder %s379_s25, %s509_s17 }
 0x230   : > { %p381_p7 = pnand %p380_p4, %p485_p5 }
 0x231   : > { %p386_p11 = por %p385_p10, %p384_p9 }
 0x232   : > { %p382_p8 = pneg %p381_p7 }
 0x233   : > { %p388_p13 = por %p387_p12, %p386_p11 }
 0x235   : > { %p389_p0 = pnand %p388_p13, %p382_p8 }
 0x237   : > { %392 = shalt.err (!%p389_p0)
}
 0x238   : > { %319 = dma.vmem_to_hbm [thread:$0]  (%p485_p5), %s511_s7, 128, %s509_s17, %s218_s13  }
 0x239 PF: > { %p325_p1 = scmp.ge.s32.totalorder %s427_s12, 2  ;;  %s243_s3 = sand.u32 1, %s415_s9  }
 0x23a   : > { %s244_s4 = scalar_lea.sflag [#allocation3], %s243_s3 }
 0x23b   : > { %p322_p2 = pnand %p325_p1, %p489_p6 }
 0x23d   : > { %410 = dma.done.wait (!%p322_p2), %s244_s4, 128  }
 0x23e   : > { %412 = vsyncadd (!%p322_p2), %s244_s4, 4294967168  ;;  %p12_p3 = scmp.ge.s32.totalorder %s472_s15, 5   ;;  %s556_s9 = smov %s419_s10 }
 0x23f   : > { %s557_s10 = smov %s423_s11  ;;  %s558_s11 = smov %s483_s18 }
 0x240   : > { %s559_s12 = smov %s472_s15  ;;  %14 = sbr.rel (!%p12_p3) target bundleno = 3 (0x3), region = 66 }
 0x247   :  { %249 = vsyncpa [#allocation3], 1 }
 0x248   :  { %251 = vsyncpa [#allocation3 + $0x1], 1 }

</bundles_post_ra>
